<compile_context>
chip_gen: v5e
topology: v5e:2x2
jax: 0.10.0
libtpu: 0.0.40
codegen_flags: <defaults>
</compile_context>

<pallas_src>
import jax
import jax.numpy as jnp
from jax.experimental import pallas as pl
from jax.experimental.pallas import tpu as pltpu

LOWER = 5e-06
LANES = 128
SUBLANES = 8
SLAB = LANES * SUBLANES            # 1024 elements = one full 8x128 f32 vreg tile
ROWS_TILE_DEFAULT = 2048           # (2, 2048, 128) f32 block = 2 MiB

# Unused-in-forward parameter from the PyTorch __init__ (kept for parity).
CENTERS = jnp.array([[-3.0, 0.0], [3.0, 0.0]], dtype=jnp.float32)


def toy_kernel(x_ref, f_ref):
    """Elementwise hot path on a (2, rows_tile, 128) tile.

    x_ref[0] = x1 tile, x_ref[1] = x2 tile; f_ref[0] = f1, f_ref[1] = f2.
    """
    x1 = x_ref[0]  # (rows_tile, 128) float32
    x2 = x_ref[1]  # (rows_tile, 128) float32

    # Deduplicated transcendentals: tanh(-x2) == -tanh(x2); clamp(tanh(+-x2/2), 0).
    t = jnp.tanh(x2)
    th = jnp.tanh(0.5 * x2)

    # torch.clamp(v, LOWER) == max(v, LOWER); .abs().log() as in the reference.
    f1 = jnp.log(jnp.maximum(jnp.abs(0.5 * (-x1 - 7.0) + t), LOWER)) + 6.0
    f2 = jnp.log(jnp.maximum(jnp.abs(0.5 * (-x1 + 3.0) - t + 2.0), LOWER)) + 6.0

    c1 = jnp.maximum(th, 0.0)
    c2 = jnp.maximum(-th, 0.0)

    # ((-x1)^2 + 0.1*(-x2)^2)/10 - 20, with negations dropped and div -> mul.
    f_sq = (x1 * x1 + 0.1 * (x2 * x2)) * 0.1 - 20.0

    f_ref[0] = f1 * c1 + f_sq * c2  # lane-dense full-tile stores (unmasked vst)
    f_ref[1] = f2 * c1 + f_sq * c2


def toy_forward(x, rows_per_tile=ROWS_TILE_DEFAULT):
    """batch=True: x (B, 2) f32 -> f (2, B) f32.  batch=False: x (2,) -> f (2,)."""
    x = jnp.asarray(x, jnp.float32)
    if x.ndim == 1:                       # PyTorch batch=False path (single point)
        return toy_forward(x[None, :], rows_per_tile)[:, 0]

    B = x.shape[0]

    # Pad only to one 8x128 slab (not to a multiple of the grid tile); Pallas
    # handles the ragged last block, so aligned batches need no pad / no slice.
    B_pad = pl.cdiv(B, SLAB) * SLAB
    rows_pad = B_pad // LANES                      # multiple of 8
    rows_tile = min(rows_per_tile, rows_pad)       # multiple of 8
    grid = (pl.cdiv(rows_pad, rows_tile),)

    # Intrinsic layout flip of the op; allow_input_fusion lets XLA fold this
    # into the pallas_call operand under jit instead of an extra HBM pass.
    xt = x.T                                       # (2, B)
    if B_pad != B:
        xt = jnp.pad(xt, ((0, 0), (0, B_pad - B)))
    xt = xt.reshape(2, rows_pad, LANES)            # (2, rows_pad, 128)

    f = pl.pallas_call(
        toy_kernel,
        out_shape=jax.ShapeDtypeStruct((2, rows_pad, LANES), jnp.float32),
        grid=grid,
        in_specs=[pl.BlockSpec((2, rows_tile, LANES), lambda i: (0, i, 0))],
        out_specs=pl.BlockSpec((2, rows_tile, LANES), lambda i: (0, i, 0)),
        compiler_params=pltpu.CompilerParams(
            dimension_semantics=("parallel",),
            allow_input_fusion=[True],
        ),
    )(xt)

    f = f.reshape(2, B_pad)
    return f if B_pad == B else f[:, :B]


def toy_reference(x):
    """Pure-JAX reference mirroring the PyTorch forward (batch=True)."""
    x = jnp.asarray(x, jnp.float32)
    x1, x2 = x[:, 0], x[:, 1]
    f1 = jnp.log(jnp.maximum(jnp.abs(0.5 * (-x1 - 7.0) - jnp.tanh(-x2)), LOWER)) + 6.0
    f2 = jnp.log(jnp.maximum(jnp.abs(0.5 * (-x1 + 3.0) + jnp.tanh(-x2) + 2.0), LOWER)) + 6.0
    c1 = jnp.maximum(jnp.tanh(x2 * 0.5), 0.0)
    c2 = jnp.maximum(jnp.tanh(-x2 * 0.5), 0.0)
    f_sq = ((-x1) ** 2 + 0.1 * (-x2) ** 2) / 10.0 - 20.0
    return jnp.stack([f1 * c1 + f_sq * c2, f2 * c1 + f_sq * c2])


if __name__ == "__main__":
    toy = jax.jit(toy_forward)

    # Small batch (B=8 -> padded to a single 8x128 slab, grid of 1).
    B = 8
    x_small = jax.random.normal(jax.random.PRNGKey(0), (B, 2), dtype=jnp.float32) * 4.0
    f_small = jax.block_until_ready(toy(x_small))
    assert f_small.shape == (2, B)
    assert jnp.allclose(f_small, toy_reference(x_small), atol=1e-5, rtol=1e-5)

    # Non-multiple-of-128 batch (lane padding + slice-back path).
    B2 = 300
    x_mid = jax.random.normal(jax.random.PRNGKey(1), (B2, 2), dtype=jnp.float32) * 4.0
    f_mid = jax.block_until_ready(toy(x_mid))
    assert f_mid.shape == (2, B2)
    assert jnp.allclose(f_mid, toy_reference(x_mid), atol=1e-5, rtol=1e-5)

    # Aligned batch (no pad, no slice-back; fused-input fast path).
    B3 = 1024
    x_big = jax.random.normal(jax.random.PRNGKey(2), (B3, 2), dtype=jnp.float32) * 4.0
    f_big = jax.block_until_ready(toy(x_big))
    assert f_big.shape == (2, B3)
    assert jnp.allclose(f_big, toy_reference(x_big), atol=1e-5, rtol=1e-5)

    # batch=False (single 2-vector) path.
    x_pt = jnp.array([1.5, -2.0], dtype=jnp.float32)
    f_pt = jax.block_until_ready(toy_forward(x_pt))
    assert f_pt.shape == (2,)
    assert jnp.allclose(f_pt, toy_reference(x_pt[None, :])[:, 0], atol=1e-5, rtol=1e-5)

    print("KERNEL_OK")
</pallas_src>

<mosaic_0001>
module attributes {stable_mosaic.version = 11 : i64} {
  func.func @toy_kernel(%arg0: i32, %arg1: memref<2x8x128xf32, #tpu.memory_space<vmem>>, %arg2: memref<2x8x128xf32, #tpu.memory_space<vmem>>) attributes {dimension_semantics = [#tpu.dimension_semantics<parallel>], iteration_bounds = array<i64: 1>, scalar_prefetch = 0 : i64, scratch_operands = 0 : i64, tpu.core_type = #tpu.core_type<tc>, window_params = [{transform_indices = @transform_0, window_bounds = array<i64: 2, 8, 128>}, {transform_indices = @transform_1, window_bounds = array<i64: 2, 8, 128>}]} {
    %c0 = arith.constant 0 : index
    %c0_0 = arith.constant 0 : index
    %c0_1 = arith.constant 0 : index
    %0 = vector.load %arg1[%c0, %c0_0, %c0_1] : memref<2x8x128xf32, #tpu.memory_space<vmem>>, vector<1x8x128xf32>
    %1 = vector.shape_cast %0 : vector<1x8x128xf32> to vector<8x128xf32>
    %c1 = arith.constant 1 : index
    %c0_2 = arith.constant 0 : index
    %c0_3 = arith.constant 0 : index
    %2 = vector.load %arg1[%c1, %c0_2, %c0_3] : memref<2x8x128xf32, #tpu.memory_space<vmem>>, vector<1x8x128xf32>
    %3 = vector.shape_cast %2 : vector<1x8x128xf32> to vector<8x128xf32>
    %4 = math.tanh %3 : vector<8x128xf32>
    %cst = arith.constant 5.000000e-01 : f32
    %5 = vector.broadcast %cst : f32 to vector<8x128xf32>
    %6 = arith.mulf %5, %3 : vector<8x128xf32>
    %7 = math.tanh %6 : vector<8x128xf32>
    %cst_4 = arith.constant 0.000000e+00 : f32
    %8 = vector.broadcast %cst_4 : f32 to vector<8x128xf32>
    %9 = arith.subf %8, %1 : vector<8x128xf32>
    %cst_5 = arith.constant 7.000000e+00 : f32
    %10 = vector.broadcast %cst_5 : f32 to vector<8x128xf32>
    %11 = arith.subf %9, %10 : vector<8x128xf32>
    %cst_6 = arith.constant 5.000000e-01 : f32
    %12 = vector.broadcast %cst_6 : f32 to vector<8x128xf32>
    %13 = arith.mulf %12, %11 : vector<8x128xf32>
    %14 = arith.addf %13, %4 : vector<8x128xf32>
    %15 = math.absf %14 : vector<8x128xf32>
    %cst_7 = arith.constant 5.000000e-06 : f32
    %16 = vector.broadcast %cst_7 : f32 to vector<8x128xf32>
    %17 = arith.maximumf %15, %16 : vector<8x128xf32>
    %18 = math.log %17 : vector<8x128xf32>
    %cst_8 = arith.constant 6.000000e+00 : f32
    %19 = vector.broadcast %cst_8 : f32 to vector<8x128xf32>
    %20 = arith.addf %18, %19 : vector<8x128xf32>
    %cst_9 = arith.constant 0.000000e+00 : f32
    %21 = vector.broadcast %cst_9 : f32 to vector<8x128xf32>
    %22 = arith.subf %21, %1 : vector<8x128xf32>
    %cst_10 = arith.constant 3.000000e+00 : f32
    %23 = vector.broadcast %cst_10 : f32 to vector<8x128xf32>
    %24 = arith.addf %22, %23 : vector<8x128xf32>
    %cst_11 = arith.constant 5.000000e-01 : f32
    %25 = vector.broadcast %cst_11 : f32 to vector<8x128xf32>
    %26 = arith.mulf %25, %24 : vector<8x128xf32>
    %27 = arith.subf %26, %4 : vector<8x128xf32>
    %cst_12 = arith.constant 2.000000e+00 : f32
    %28 = vector.broadcast %cst_12 : f32 to vector<8x128xf32>
    %29 = arith.addf %27, %28 : vector<8x128xf32>
    %30 = math.absf %29 : vector<8x128xf32>
    %cst_13 = arith.constant 5.000000e-06 : f32
    %31 = vector.broadcast %cst_13 : f32 to vector<8x128xf32>
    %32 = arith.maximumf %30, %31 : vector<8x128xf32>
    %33 = math.log %32 : vector<8x128xf32>
    %cst_14 = arith.constant 6.000000e+00 : f32
    %34 = vector.broadcast %cst_14 : f32 to vector<8x128xf32>
    %35 = arith.addf %33, %34 : vector<8x128xf32>
    %cst_15 = arith.constant 0.000000e+00 : f32
    %36 = vector.broadcast %cst_15 : f32 to vector<8x128xf32>
    %37 = arith.maximumf %7, %36 : vector<8x128xf32>
    %cst_16 = arith.constant 0.000000e+00 : f32
    %38 = vector.broadcast %cst_16 : f32 to vector<8x128xf32>
    %39 = arith.subf %38, %7 : vector<8x128xf32>
    %cst_17 = arith.constant 0.000000e+00 : f32
    %40 = vector.broadcast %cst_17 : f32 to vector<8x128xf32>
    %41 = arith.maximumf %39, %40 : vector<8x128xf32>
    %42 = arith.mulf %1, %1 : vector<8x128xf32>
    %43 = arith.mulf %3, %3 : vector<8x128xf32>
    %cst_18 = arith.constant 1.000000e-01 : f32
    %44 = vector.broadcast %cst_18 : f32 to vector<8x128xf32>
    %45 = arith.mulf %44, %43 : vector<8x128xf32>
    %46 = arith.addf %42, %45 : vector<8x128xf32>
    %cst_19 = arith.constant 1.000000e-01 : f32
    %47 = vector.broadcast %cst_19 : f32 to vector<8x128xf32>
    %48 = arith.mulf %46, %47 : vector<8x128xf32>
    %cst_20 = arith.constant 2.000000e+01 : f32
    %49 = vector.broadcast %cst_20 : f32 to vector<8x128xf32>
    %50 = arith.subf %48, %49 : vector<8x128xf32>
    %51 = arith.mulf %20, %37 : vector<8x128xf32>
    %52 = arith.mulf %50, %41 : vector<8x128xf32>
    %53 = arith.addf %51, %52 : vector<8x128xf32>
    %c0_21 = arith.constant 0 : index
    %c0_22 = arith.constant 0 : index
    %c0_23 = arith.constant 0 : index
    %54 = vector.load %arg2[%c0_21, %c0_22, %c0_23] : memref<2x8x128xf32, #tpu.memory_space<vmem>>, vector<1x8x128xf32>
    %55 = vector.shape_cast %54 : vector<1x8x128xf32> to vector<8x128xf32>
    %56 = vector.shape_cast %53 : vector<8x128xf32> to vector<1x8x128xf32>
    tpu.vector_store %arg2[%c0_21, %c0_22, %c0_23], %56 {strides = array<i32>} : memref<2x8x128xf32, #tpu.memory_space<vmem>>, vector<1x8x128xf32>,
    %57 = arith.mulf %35, %37 : vector<8x128xf32>
    %58 = arith.mulf %50, %41 : vector<8x128xf32>
    %59 = arith.addf %57, %58 : vector<8x128xf32>
    %c1_24 = arith.constant 1 : index
    %c0_25 = arith.constant 0 : index
    %c0_26 = arith.constant 0 : index
    %60 = vector.load %arg2[%c1_24, %c0_25, %c0_26] : memref<2x8x128xf32, #tpu.memory_space<vmem>>, vector<1x8x128xf32>
    %61 = vector.shape_cast %60 : vector<1x8x128xf32> to vector<8x128xf32>
    %62 = vector.shape_cast %59 : vector<8x128xf32> to vector<1x8x128xf32>
    tpu.vector_store %arg2[%c1_24, %c0_25, %c0_26], %62 {strides = array<i32>} : memref<2x8x128xf32, #tpu.memory_space<vmem>>, vector<1x8x128xf32>,
    return
  }
  func.func @transform_0(%arg0: i32) -> (i32, i32, i32) {
    %c0_i32 = arith.constant 0 : i32
    %c0_i32_0 = arith.constant 0 : i32
    %c0_i32_1 = arith.constant 0 : i32
    return %c0_i32, %arg0, %c0_i32_0 : i32, i32, i32
  }
  func.func @transform_1(%arg0: i32) -> (i32, i32, i32) {
    %c0_i32 = arith.constant 0 : i32
    %c0_i32_0 = arith.constant 0 : i32
    %c0_i32_1 = arith.constant 0 : i32
    return %c0_i32, %arg0, %c0_i32_0 : i32, i32, i32
  }
}

</mosaic_0001>

<bundles_post_ra>
// kernel: toy_forward.2
= control target key start
LH: loop header
LB: loop body
LE: loop exit
PB: predicated region body
PF: predicated region fallthrough
CT: control target
= control target key end

     0   :  { %s97_s0 = inlined_call_operand.vmem [shape: f32[1,2,8,128], index: 0, kind: input, shape index: {}]   ;;  %s98_s1 = inlined_call_operand.vmem [shape: f32[2,8,128], index: 1, kind: output, shape index: {}]  }
   0x1   :  { %v8_v0 = vld [vmem:[%s97_s0] sm:$0xff]  ;;  %v63_v1 = vld [vmem:[%s97_s0 + $0x8] sm:$0xff] }
   0x2   :  { %67 = vtanh.f32 %v63_v1  ;;  %v24_v2 = vsub.f32 0.0, %v8_v0  ;;  %v22_v3 = vmul.f32 0.5, %v63_v1  ;;  %v46_v6 = vmul.f32 %v63_v1, %v63_v1 }
   0x3   :  { %v45_v10 = vmul.f32 %v8_v0, %v8_v0 }
   0x4   :  { %v64_v4 = vadd.f32 -7.0, %v24_v2  ;;  %v33_v5 = vadd.f32 3.0, %v24_v2  ;;  %69 = vtanh.f32 %v22_v3  ;;  %v47_v11 = vmul.f32 0.1, %v46_v6 }
   0x6   :  { %v26_v7 = vmul.f32 0.5, %v64_v4  ;;  %v34_v8 = vmul.f32 0.5, %v33_v5  ;;  %v48_v16 = vadd.f32 %v47_v11, %v45_v10 }
   0x8   :  { %v68_v9 = vpop.eup %67  ;;  %v49_v22 = vmul.f32 0.1, %v48_v16 }
   0x9   :  { %v27_v12 = vadd.f32 %v68_v9, %v26_v7  ;;  %v35_v13 = vsub.f32 %v34_v8, %v68_v9 }
   0xa   :  { %v70_v17 = vpop.eup %69  ;;  %v65_v24 = vadd.f32 -20.0, %v49_v22 }
   0xb   :  { %v28_v14 = vand.u32 2147483647, %v27_v12  ;;  %v36_v15 = vadd.f32 2.0, %v35_v13  ;;  %v43_v21 = vsub.f32 0.0, %v70_v17  ;;  %v42_v27 = vmax.f32 %v70_v17, 0.0 }
   0xd   :  { %v29_v18 = vmax.f32 %v28_v14, 5e-06  ;;  %v37_v19 = vand.u32 2147483647, %v36_v15  ;;  %v44_v23 = vmax.f32 %v43_v21, 0.0 }
   0xf   :  { %71 = vlog2.f32 %v29_v18  ;;  %v38_v20 = vmax.f32 %v37_v19, 5e-06  ;;  %v52_v31 = vmul.f32 %v65_v24, %v44_v23 }
  0x11   :  { %73 = vlog2.f32 %v38_v20 }
  0x15   :  { %v72_v25 = vpop.eup %71 }
  0x16   :  { %v31_v26 = vmul.f32 0.6931472, %v72_v25 }
  0x17   :  { %v74_v28 = vpop.eup %73 }
  0x18   :  { %v32_v29 = vadd.f32 6.0, %v31_v26  ;;  %v40_v30 = vmul.f32 0.6931472, %v74_v28 }
  0x1a   :  { %v41_v32 = vadd.f32 6.0, %v40_v30  ;;  %v51_v33 = vmul.f32 %v42_v27, %v32_v29 }
  0x1c   :  { %v53_v34 = vadd.f32 %v52_v31, %v51_v33  ;;  %v55_v35 = vmul.f32 %v42_v27, %v41_v32 }
  0x1e   :  { %54 = vst [vmem:[%s98_s1] sm:$0xff] %v53_v34  ;;  %v56_v36 = vadd.f32 %v55_v35, %v52_v31 }
  0x20   :  { %66 = vst [vmem:[%s98_s1 + $0x8] sm:$0xff] %v56_v36 }

</bundles_post_ra>
